<compile_context>
chip_gen: v7x
topology: tpu7x:2x2x1
jax: 0.10.0
libtpu: 0.0.40
codegen_flags: <defaults>
</compile_context>

<pallas_src>
import functools

import jax
import jax.numpy as jnp
from jax import lax
from jax.experimental import pallas as pl
from jax.experimental.pallas import tpu as pltpu

CONFIG = [(32, 3, 1), (64, 3, 2), ['B', 1], (128, 3, 2), ['B', 2],
          (256, 3, 2), ['B', 8], (512, 3, 2), ['B', 8], (1024, 3, 2),
          ['B', 4], (512, 1, 1), (1024, 3, 1), 'S', (256, 1, 1), 'U',
          (256, 1, 1), (512, 3, 1), 'S', (128, 1, 1), 'U', (128, 1, 1),
          (256, 3, 1), 'S']

LEAKY_SLOPE = 0.1
BN_EPS = 1e-5


def _round_up(x, m):
    return ((x + m - 1) // m) * m


# ---------------------------------------------------------------------------
# Pallas kernel: K-tiled matmul accumulator + bias + LeakyReLU + residual
# ---------------------------------------------------------------------------
def _conv_kernel(use_bn_act, add_residual, *refs):
    if add_residual:
        a_ref, w_ref, b_ref, r_ref, o_ref, acc_ref = refs
    else:
        a_ref, w_ref, b_ref, o_ref, acc_ref = refs

    k = pl.program_id(2)

    @pl.when(k == 0)
    def _():
        acc_ref[...] = jnp.zeros_like(acc_ref)

    # bf16 x bf16 -> f32 accumulation on the MXU.
    acc_ref[...] += jnp.dot(a_ref[...], w_ref[...],
                            preferred_element_type=jnp.float32)

    @pl.when(k == pl.num_programs(2) - 1)
    def _():
        y = acc_ref[...] + b_ref[...]                 # conv bias / folded BN beta
        if use_bn_act:
            y = jnp.where(y > 0, y, LEAKY_SLOPE * y)  # LeakyReLU(0.1)
        if add_residual:
            y = y + r_ref[...]                        # x = x + layer(x)
        o_ref[...] = y.astype(o_ref.dtype)


def _im2col(x, k, stride, padding):
    """x: (N, H, W, C) -> (N*Ho*Wo, k*k*C) with (kh, kw, ci) column ordering."""
    N, H, W, C = x.shape
    if padding:
        x = jnp.pad(x, ((0, 0), (padding, padding), (padding, padding), (0, 0)))
    Hp, Wp = x.shape[1], x.shape[2]
    Ho = (Hp - k) // stride + 1
    Wo = (Wp - k) // stride + 1
    if k == 1 and stride == 1:
        return x.reshape(N * Ho * Wo, C), Ho, Wo
    cols = []
    for ih in range(k):
        for iw in range(k):
            patch = lax.slice(
                x,
                (0, ih, iw, 0),
                (N, ih + (Ho - 1) * stride + 1, iw + (Wo - 1) * stride + 1, C),
                (1, stride, stride, 1))
            cols.append(patch)                  # (N, Ho, Wo, C)
    a = jnp.stack(cols, axis=3)                 # (N, Ho, Wo, k*k, C)
    return a.reshape(N * Ho * Wo, k * k * C), Ho, Wo


@functools.partial(jax.jit, static_argnames=("stride", "padding", "use_bn_act"))
def conv2d_block(x, weight, bias, *, stride, padding, use_bn_act,
                 residual=None):
    """One CNNBlock: conv2d (+folded BN + LeakyReLU) (+residual add).

    x: (N, H, W, Cin) float32, weight: (Cout, Cin, k, k) float32 with the BN
    scale already folded in.  Returns (N, Ho, Wo, Cout) float32.
    """
    N, H, W, Cin = x.shape
    Cout, _, kh, kw = weight.shape

    # im2col in bf16 (halves the glue-level HBM traffic and the A tiles).
    a, Ho, Wo = _im2col(x.astype(jnp.bfloat16), kh, stride, padding)
    M, Kdim = a.shape

    # (Cout, Cin, kh, kw) -> (kh, kw, Cin, Cout) -> (kh*kw*Cin, Cout), bf16.
    w2 = jnp.transpose(weight, (2, 3, 1, 0)).reshape(Kdim, Cout)
    w2 = w2.astype(jnp.bfloat16)
    b2 = bias.reshape(1, Cout).astype(jnp.float32)

    # --- tile selection -----------------------------------------------------
    # M (rows = N*Ho*Wo): tile at <=256, multiples of 16 (bf16 sublane pack).
    tm = min(256, _round_up(M, 16))
    M_p = _round_up(M, tm)
    # Cout: pad to lane-dense multiples of 128 (avoids masked vst on the head).
    C_p = _round_up(Cout, 128)
    tn = 256 if C_p % 256 == 0 else 128
    # K (kh*kw*Cin): keep whole if small, otherwise tile at 512 (deep 3x3s
    # have K = 4608 / 9216 which are exact multiples of 512).
    K_p = _round_up(Kdim, 128)
    if K_p > 2560:
        tk = 512
        K_p = _round_up(Kdim, tk)
    else:
        tk = K_p

    a = jnp.pad(a, ((0, M_p - M), (0, K_p - Kdim)))
    w2 = jnp.pad(w2, ((0, K_p - Kdim), (0, C_p - Cout)))
    b2 = jnp.pad(b2, ((0, 0), (0, C_p - Cout)))

    grid = (M_p // tm, C_p // tn, K_p // tk)   # reduction axis last

    in_specs = [
        pl.BlockSpec((tm, tk), lambda i, j, k: (i, k)),   # im2col tile
        pl.BlockSpec((tk, tn), lambda i, j, k: (k, j)),   # weight tile
        pl.BlockSpec((1, tn), lambda i, j, k: (0, j)),    # per-channel bias
    ]
    args = [a, w2, b2]
    if residual is not None:
        r = residual.reshape(M, Cout).astype(jnp.float32)
        r = jnp.pad(r, ((0, M_p - M), (0, C_p - Cout)))
        args.append(r)
        in_specs.append(pl.BlockSpec((tm, tn), lambda i, j, k: (i, j)))

    kernel = functools.partial(_conv_kernel, use_bn_act, residual is not None)
    out = pl.pallas_call(
        kernel,
        out_shape=jax.ShapeDtypeStruct((M_p, C_p), jnp.float32),
        grid=grid,
        in_specs=in_specs,
        out_specs=pl.BlockSpec((tm, tn), lambda i, j, k: (i, j)),
        scratch_shapes=[pltpu.VMEM((tm, tn), jnp.float32)],
        compiler_params=pltpu.CompilerParams(
            dimension_semantics=("parallel", "parallel", "arbitrary"),
            vmem_limit_bytes=32 * 1024 * 1024),
    )(*args)

    out = out[:M, :Cout]
    return out.reshape(N, Ho, Wo, Cout)


# ---------------------------------------------------------------------------
# Deterministic parameter construction (mirrors YOLOv3._create_conv_layers)
# ---------------------------------------------------------------------------
def _init_cnn_block(key, cin, cout, k, bn_act):
    k1, k2, k3 = jax.random.split(key, 3)
    fan_in = cin * k * k
    w = jax.random.normal(k1, (cout, cin, k, k), jnp.float32) * jnp.sqrt(
        2.0 / fan_in)
    if bn_act:
        gamma = 1.0 + 0.1 * jax.random.normal(k2, (cout,), jnp.float32)
        beta = 0.1 * jax.random.normal(k3, (cout,), jnp.float32)
        running_mean = jnp.zeros((cout,), jnp.float32)
        running_var = jnp.ones((cout,), jnp.float32)
        scale = gamma / jnp.sqrt(running_var + BN_EPS)   # fold eval-mode BN
        bias = beta - running_mean * scale
        w = w * scale[:, None, None, None]               # scale folded into W
    else:
        bias = 0.1 * jax.random.normal(k2, (cout,), jnp.float32)  # conv bias
    return {"w": w, "bias": bias, "bn_act": bn_act}


def build_yolov3_params(key, in_channels=3, num_classes=80):
    layers = []
    cin = in_channels
    keys = iter(jax.random.split(key, 512))

    def nk():
        return next(keys)

    for module in CONFIG:
        if isinstance(module, tuple):
            cout, ksz, stride = module
            layers.append({"type": "cnn", "stride": stride,
                           "padding": 1 if ksz == 3 else 0,
                           "block": _init_cnn_block(nk(), cin, cout, ksz, True)})
            cin = cout
        elif isinstance(module, list):
            num_repeats = module[1]
            reps = []
            for _ in range(num_repeats):
                reps.append((_init_cnn_block(nk(), cin, cin // 2, 1, True),
                             _init_cnn_block(nk(), cin // 2, cin, 3, True)))
            layers.append({"type": "res", "use_residual": True,
                           "num_repeats": num_repeats, "reps": reps})
        elif module == 'S':
            reps = [(_init_cnn_block(nk(), cin, cin // 2, 1, True),
                     _init_cnn_block(nk(), cin // 2, cin, 3, True))]
            layers.append({"type": "res", "use_residual": False,
                           "num_repeats": 1, "reps": reps})
            layers.append({"type": "cnn", "stride": 1, "padding": 0,
                           "block": _init_cnn_block(nk(), cin, cin // 2, 1, True)})
            cin = cin // 2
            pred = (_init_cnn_block(nk(), cin, 2 * cin, 3, True),
                    _init_cnn_block(nk(), 2 * cin, (num_classes + 5) * 3, 1,
                                    False))
            layers.append({"type": "pred", "blocks": pred,
                           "num_classes": num_classes})
        elif module == 'U':
            layers.append({"type": "up"})
            cin = cin * 3
    return layers


# ---------------------------------------------------------------------------
# Forward pass (mirrors YOLOv3.forward)
# ---------------------------------------------------------------------------
def _apply_cnn(x, blk, stride, padding, residual=None):
    return conv2d_block(x, blk["w"], blk["bias"],
                        stride=stride, padding=padding,
                        use_bn_act=blk["bn_act"], residual=residual)


def yolov3_forward(layers, x_nchw):
    x = jnp.transpose(x_nchw, (0, 2, 3, 1)).astype(jnp.float32)  # NCHW -> NHWC
    outputs = []
    routes = []
    for layer in layers:
        t = layer["type"]
        if t == "pred":
            b1, b2 = layer["blocks"]
            h = _apply_cnn(x, b1, 1, 1)
            p = _apply_cnn(h, b2, 1, 0)             # (N, H, W, 3*(nc+5))
            N, Ho, Wo, _ = p.shape
            nc = layer["num_classes"]
            # torch: .reshape(N, 3, nc+5, H, W).permute(0, 1, 3, 4, 2)
            out = p.reshape(N, Ho, Wo, 3, nc + 5).transpose(0, 3, 1, 2, 4)
            outputs.append(out)
            continue
        if t == "cnn":
            x = _apply_cnn(x, layer["block"], layer["stride"],
                           layer["padding"])
        elif t == "res":
            for b1, b2 in layer["reps"]:
                h = _apply_cnn(x, b1, 1, 0)
                if layer["use_residual"]:
                    x = _apply_cnn(h, b2, 1, 1, residual=x)
                else:
                    x = _apply_cnn(h, b2, 1, 1)
            if layer["num_repeats"] == 8:
                routes.append(x)
        elif t == "up":
            # nn.Upsample(scale_factor=2), mode='nearest'
            x = jnp.repeat(jnp.repeat(x, 2, axis=1), 2, axis=2)
            x = jnp.concatenate([x, routes[-1]], axis=-1)  # cat on channels
            routes.pop()
    return outputs


# ---------------------------------------------------------------------------
if __name__ == "__main__":
    key = jax.random.PRNGKey(0)
    pkey, xkey = jax.random.split(key)

    num_classes = 4                      # small head, same structure as nc=80
    batch, in_channels, spatial = 2, 3, 32   # spatial must be divisible by 32

    layers = build_yolov3_params(pkey, in_channels=in_channels,
                                 num_classes=num_classes)
    x = jax.random.normal(xkey, (batch, in_channels, spatial, spatial),
                          jnp.float32)   # PyTorch-style NCHW input

    outs = yolov3_forward(layers, x)
    outs = jax.block_until_ready(outs)

    s = spatial // 32
    expected = [(batch, 3, s, s, num_classes + 5),
                (batch, 3, 2 * s, 2 * s, num_classes + 5),
                (batch, 3, 4 * s, 4 * s, num_classes + 5)]
    got = [tuple(o.shape) for o in outs]
    assert got == expected, (got, expected)
    assert all(bool(jnp.all(jnp.isfinite(o))) for o in outs)
    print("KERNEL_OK")
</pallas_src>

<mosaic_0001>
module attributes {stable_mosaic.version = 11 : i64} {
  func.func @_conv_kernel(%arg0: i32, %arg1: i32, %arg2: i32, %arg3: memref<256x128xbf16, #tpu.memory_space<vmem>>, %arg4: memref<128x128xbf16, #tpu.memory_space<vmem>>, %arg5: memref<1x128xf32, #tpu.memory_space<vmem>>, %arg6: memref<256x128xf32, #tpu.memory_space<vmem>>, %arg7: memref<256x128xf32, #tpu.memory_space<vmem>>) attributes {dimension_semantics = [#tpu.dimension_semantics<parallel>, #tpu.dimension_semantics<parallel>, #tpu.dimension_semantics<arbitrary>], iteration_bounds = array<i64: 8, 1, 1>, scalar_prefetch = 0 : i64, scratch_operands = 1 : i64, tpu.core_type = #tpu.core_type<tc>, window_params = [{transform_indices = @transform_0, window_bounds = array<i64: 256, 128>}, {transform_indices = @transform_1, window_bounds = array<i64: 128, 128>}, {transform_indices = @transform_2, window_bounds = array<i64: 1, 128>}, {transform_indices = @transform_3, window_bounds = array<i64: 256, 128>}]} {
    %c0_i32 = arith.constant 0 : i32
    %0 = arith.cmpi eq, %arg2, %c0_i32 : i32
    %1 = arith.extui %0 : i1 to i32
    %c0_i32_0 = arith.constant 0 : i32
    %2 = arith.cmpi ne, %1, %c0_i32_0 : i32
    scf.if %2 {
      %cst_10 = arith.constant 0.000000e+00 : f32
      %12 = vector.broadcast %cst_10 : f32 to vector<256x128xf32>
      %c0_11 = arith.constant 0 : index
      %c0_12 = arith.constant 0 : index
      %13 = vector.load %arg7[%c0_11, %c0_12] : memref<256x128xf32, #tpu.memory_space<vmem>>, vector<256x128xf32>
      tpu.vector_store %arg7[%c0_11, %c0_12], %12 {strides = array<i32>} : memref<256x128xf32, #tpu.memory_space<vmem>>, vector<256x128xf32>,
    } else {
    }
    %c0 = arith.constant 0 : index
    %c0_1 = arith.constant 0 : index
    %3 = vector.load %arg7[%c0, %c0_1] : memref<256x128xf32, #tpu.memory_space<vmem>>, vector<256x128xf32>
    %c0_2 = arith.constant 0 : index
    %c0_3 = arith.constant 0 : index
    %4 = vector.load %arg3[%c0_2, %c0_3] : memref<256x128xbf16, #tpu.memory_space<vmem>>, vector<256x128xbf16>
    %c0_4 = arith.constant 0 : index
    %c0_5 = arith.constant 0 : index
    %5 = vector.load %arg4[%c0_4, %c0_5] : memref<128x128xbf16, #tpu.memory_space<vmem>>, vector<128x128xbf16>
    %cst = arith.constant dense<0.000000e+00> : vector<256x128xf32>
    %6 = tpu.matmul %4, %5, %cst {dimension_numbers = #tpu.dot_dimension_numbers<[1], [0], [0], [1], [0, 0, 1, 1], [], []>} : vector<256x128xbf16>, vector<128x128xbf16>, vector<256x128xf32> -> vector<256x128xf32>
    %7 = arith.addf %3, %6 : vector<256x128xf32>
    %c0_6 = arith.constant 0 : index
    %c0_7 = arith.constant 0 : index
    %8 = vector.load %arg7[%c0_6, %c0_7] : memref<256x128xf32, #tpu.memory_space<vmem>>, vector<256x128xf32>
    tpu.vector_store %arg7[%c0_6, %c0_7], %7 {strides = array<i32>} : memref<256x128xf32, #tpu.memory_space<vmem>>, vector<256x128xf32>,
    %c0_i32_8 = arith.constant 0 : i32
    %9 = arith.cmpi eq, %arg2, %c0_i32_8 : i32
    %10 = arith.extui %9 : i1 to i32
    %c0_i32_9 = arith.constant 0 : i32
    %11 = arith.cmpi ne, %10, %c0_i32_9 : i32
    scf.if %11 {
      %c0_10 = arith.constant 0 : index
      %c0_11 = arith.constant 0 : index
      %12 = vector.load %arg7[%c0_10, %c0_11] : memref<256x128xf32, #tpu.memory_space<vmem>>, vector<256x128xf32>
      %c0_12 = arith.constant 0 : index
      %c0_13 = arith.constant 0 : index
      %13 = vector.load %arg5[%c0_12, %c0_13] : memref<1x128xf32, #tpu.memory_space<vmem>>, vector<1x128xf32>
      %14 = vector.broadcast %13 : vector<1x128xf32> to vector<256x128xf32>
      %15 = arith.addf %12, %14 : vector<256x128xf32>
      %cst_14 = arith.constant 0.000000e+00 : f32
      %16 = vector.broadcast %cst_14 : f32 to vector<256x128xf32>
      %17 = arith.cmpf ogt, %15, %16 : vector<256x128xf32>
      %cst_15 = arith.constant 1.000000e-01 : f32
      %18 = vector.broadcast %cst_15 : f32 to vector<256x128xf32>
      %19 = arith.mulf %18, %15 : vector<256x128xf32>
      %20 = arith.select %17, %15, %19 : vector<256x128xi1>, vector<256x128xf32>
      %c0_16 = arith.constant 0 : index
      %c0_17 = arith.constant 0 : index
      %21 = vector.load %arg6[%c0_16, %c0_17] : memref<256x128xf32, #tpu.memory_space<vmem>>, vector<256x128xf32>
      tpu.vector_store %arg6[%c0_16, %c0_17], %20 {strides = array<i32>} : memref<256x128xf32, #tpu.memory_space<vmem>>, vector<256x128xf32>,
    } else {
    }
    return
  }
  func.func @transform_0(%arg0: i32, %arg1: i32, %arg2: i32) -> (i32, i32) {
    %c0_i32 = arith.constant 0 : i32
    return %arg0, %arg2 : i32, i32
  }
  func.func @transform_1(%arg0: i32, %arg1: i32, %arg2: i32) -> (i32, i32) {
    %c0_i32 = arith.constant 0 : i32
    return %arg2, %arg1 : i32, i32
  }
  func.func @transform_2(%arg0: i32, %arg1: i32, %arg2: i32) -> (i32, i32) {
    %c0_i32 = arith.constant 0 : i32
    %c0_i32_0 = arith.constant 0 : i32
    return %c0_i32, %arg1 : i32, i32
  }
  func.func @transform_3(%arg0: i32, %arg1: i32, %arg2: i32) -> (i32, i32) {
    %c0_i32 = arith.constant 0 : i32
    return %arg0, %arg1 : i32, i32
  }
}

</mosaic_0001>

<bundles_post_ra>
// kernel: conv2d_block.1
= control target key start
LH: loop header
LB: loop body
LE: loop exit
PB: predicated region body
PF: predicated region fallthrough
CT: control target
= control target key end

     0   :  { %8 = vsyncpa [#allocation4], 0  ;;  %s1607_s0 = inlined_call_operand.vmem [shape: bf16[2048,128], index: 0, kind: input, shape index: {}]   ;;  %s1608_s1 = inlined_call_operand.vmem [shape: bf16[128,128], index: 1, kind: input, shape index: {}]   ;;  %s1609_s2 = inlined_call_operand.vmem [shape: f32[1,128], index: 2, kind: input, shape index: {}]   ;;  %s1610_s3 = inlined_call_operand.hbm [shape: f32[2048,128], index: 3, kind: output, shape index: {}]  }
   0x1   :  { %10 = vsyncpa [#allocation4 + $0x1], 0  ;;  %s1375_s12 = smov 0   ;;  %s1377_s13 = smov 0  }
   0x2   :  { %s1379_s14 = smov 0   ;;  %s1381_s15 = smov 0  }
   0x3   :  { %s1383_s16 = smov 0   ;;  %s1385_s17 = smov 0  }
   0x4 LB: > { %s1062_s18 = sadd.s32 4294967295, %s1350_s17   ;;  %s1063_s19 = sadd.s32 4294967294, %s1350_s17   ;;  %s1350_s17 = sphi %s1385_s17, %s16_s17   ;;  %s1346_s16 = sphi %s1383_s16, %s1617_s16   ;;  %s1342_s15 = sphi %s1381_s15, %s1616_s15   ;;  %s1338_s14 = sphi %s1379_s14, %s1615_s14   ;;  %s1334_s13 = sphi %s1377_s13, %s1614_s13   ;;  %s1330_s12 = sphi %s1375_s12, %s1613_s12  }
   0x5   : > { %s35_s20 = sadd.s32 1, %s1346_s16  ;;  %s126_s21 = sadd.s32 1, %s1338_s14 }
   0x6   : > { %p37_p0 = scmp.ge.s32.totalorder %s35_s20, 8  ;;  %p136_p1 = scmp.ne.s32.totalorder %s1338_s14, %s1334_s13 }
   0x7   : > { %p137_p2 = scmp.eq.s32.totalorder %s1062_s18, 7  ;;  %p142_p3 = scmp.ne.s32.totalorder %s1334_s13, %s1330_s12 }
   0x8   : > { %s1619_s20 = smov (%p37_p0, %s35_s20), 0  ;;  %p143_p5 = scmp.eq.s32.totalorder %s1063_s19, 7 }
   0x9   : > { %p1415_p4 = por %p137_p2, %p136_p1  ;;  %s121_s23 = ssub.s32 %s1346_s16, %s1619_s20 }
   0xa   : > { %p1068_p6 = scmp.ge.s32.totalorder %s1350_s17, 1  ;;  %p124_p7 = scmp.eq.s32.totalorder %s121_s23, 0 }
   0xb   : > { %p1422_p8 = por %p143_p5, %p142_p3  ;;  %p191_p9 = scmp.lt.s32.totalorder %s1350_s17, 9 }
   0xc   : > { %s1428_s25 = scalar_select %p124_p7, %s1338_s14, %s126_s21  }
   0xd   : > { %p192_p10 = pnand %p1068_p6, %p191_p9 }
   0xe   : > { %v1248_v0 = vld [vmem:[%s1608_s1] sm:$0xff] (!%p192_p10)   ;;  %s1070_s28 = sshll.u32 (!%p192_p10), %s1342_s15, 5  ;;  %v1249_v1 = vld [vmem:[%s1608_s1 + $0x8] sm:$0xff] (!%p192_p10)   ;;  %v1250_v2 = vld [vmem:[%s1608_s1 + $0x10] sm:$0xff] (!%p192_p10)   ;;  %s226_s30 = sand.u32 (!%p192_p10), 1, %s1334_s13  }
   0xf   : > { %195 = sbr.rel (%p192_p10) target bundleno = 310 (0x136), region = 32  ;;  %p230_p11 = scmp.lt.s32.totalorder (!%p192_p10), %s1070_s28, 255  ;;  %1127 = vmatprep.subr.bf16.mxu0 (!%p192_p10), %v1248_v0  ;;  %1175 = vmatprep.subr.bf16.mxu1 (!%p192_p10), %v1248_v0  ;;  %v1251_v3 = vld [vmem:[%s1608_s1 + $0x18] sm:$0xff] (!%p192_p10)   ;;  %v1252_v6 = vld [vmem:[%s1608_s1 + $0x20] sm:$0xff] (!%p192_p10)   ;;  %v1253_v7 = vld [vmem:[%s1608_s1 + $0x28] sm:$0xff] (!%p192_p10)  }
  0x10   : > { %1128 = vmatpush3.bf16.msra.mxu0 (!%p192_p10), %v1248_v0  ;;  %1183 = vmatpush3.bf16.msra.mxu1 (!%p192_p10), %v1248_v0  ;;  %v1254_v8 = vld [vmem:[%s1608_s1 + $0x30] sm:$0xff] (!%p192_p10)   ;;  %v1255_v9 = vld [vmem:[%s1608_s1 + $0x38] sm:$0xff] (!%p192_p10)   ;;  %v1480_v24 = vld [vmem:[%s1609_s2] ss:$0 sm:$0xff] (!%p192_p10)  ;;  %s1102_s8 = sshll.u32 (!%p192_p10), %s1342_s15, 12  ;;  %s1561_s18 = scalar_lea.sflag (!%p192_p10), [#allocation4], %s226_s30 }
  0x11   : > { %1129 = vmatprep.subr.bf16.mxu0 (!%p192_p10), %v1249_v1  ;;  %1176 = vmatprep.subr.bf16.mxu1 (!%p192_p10), %v1249_v1  ;;  %s1551_s11 = scalar_lea.hbm (!%p192_p10), %s1610_s3, %s1102_s8  ;;  %s1352_s21 = smov (!%p192_p10), [#allocation3]  }
  0x12   : > { %s1276_s23 = sshll.u32 (!%p192_p10), %s1352_s21, 4  ;;  %s1277_s23 = int_to_ptr.vmem [resolvable:$false] %s1276_s23 }
  0x13   : > { %s1278_s26 = scalar_lea.vmem (!%p192_p10), %s1277_s23, 8192 }
  0x14   : > { %1130 = vmatpush3.bf16.msra.mxu0 (!%p192_p10), %v1249_v1  ;;  %1184 = vmatpush3.bf16.msra.mxu1 (!%p192_p10), %v1249_v1 }
  0x15   : > { %1131 = vmatprep.subr.bf16.mxu0 (!%p192_p10), %v1250_v2  ;;  %1177 = vmatprep.subr.bf16.mxu1 (!%p192_p10), %v1250_v2 }
  0x16   : > { %s1621_s28 = smov (!%p230_p11, %s1070_s28), 255 }
  0x17   : > { %s1071_s6 = sshll.u32 %s1621_s28, 2 }
  0x18   : > { %s1443_s9 = scalar_lea.vmem %s1607_s0, %s1071_s6  ;;  %1132 = vmatpush3.bf16.msra.mxu0 %v1250_v2  ;;  %1185 = vmatpush3.bf16.msra.mxu1 %v1250_v2  ;;  %s1069_s6 = sshll.u32 %s226_s30, 8 }
  0x19   : > { %v1256_v4 = vld [vmem:[%s1443_s9] sm:$0xff]   ;;  %1133 = vmatprep.subr.bf16.mxu0 %v1251_v3  ;;  %1178 = vmatprep.subr.bf16.mxu1 %v1251_v3  ;;  %v1258_v10 = vld [vmem:[%s1443_s9 + $0x8] sm:$0xff]   ;;  %v1260_v12 = vld [vmem:[%s1443_s9 + $0x10] sm:$0xff]   ;;  %s1490_s7 = scalar_lea.vmem [#allocation3], %s1069_s6 }
  0x1a   : > { %v1257_v5 = vld [vmem:[%s1443_s9 + $0x40] sm:$0xff]   ;;  %1143 = vmatprep.mubr.bf16.mxu0 %v1256_v4  ;;  %v1259_v11 = vld [vmem:[%s1443_s9 + $0x48] sm:$0xff]   ;;  %v1261_v13 = vld [vmem:[%s1443_s9 + $0x50] sm:$0xff]  }
  0x1b   : > { %1159 = vmatprep.mubr.bf16.mxu1 %v1257_v5  ;;  %v1262_v14 = vld [vmem:[%s1443_s9 + $0x18] sm:$0xff]   ;;  %v1264_v16 = vld [vmem:[%s1443_s9 + $0x20] sm:$0xff]   ;;  %v1266_v18 = vld [vmem:[%s1443_s9 + $0x28] sm:$0xff]  }
  0x1c   : > { %1134 = vmatpush3.bf16.msra.mxu0 %v1251_v3  ;;  %1186 = vmatpush3.bf16.msra.mxu1 %v1251_v3  ;;  %v1263_v15 = vld [vmem:[%s1443_s9 + $0x58] sm:$0xff]   ;;  %v1265_v17 = vld [vmem:[%s1443_s9 + $0x60] sm:$0xff]   ;;  %v1267_v19 = vld [vmem:[%s1443_s9 + $0x68] sm:$0xff]  }
  0x1d   : > { %1135 = vmatprep.subr.bf16.mxu0 %v1252_v6  ;;  %1179 = vmatprep.subr.bf16.mxu1 %v1252_v6  ;;  %v1268_v20 = vld [vmem:[%s1443_s9 + $0x30] sm:$0xff]   ;;  %v1270_v22 = vld [vmem:[%s1443_s9 + $0x38] sm:$0xff]  }
  0x1e   : > { %v1269_v21 = vld [vmem:[%s1443_s9 + $0x70] sm:$0xff]   ;;  %v1271_v23 = vld [vmem:[%s1443_s9 + $0x78] sm:$0xff]   ;;  %s954_s9 = sshll.u32 %s1490_s7, 4  ;;  %s1553_s9 = int_to_ptr.vmem [resolvable:$true] %s954_s9 }
  0x1f   : > { %s1272_s19 = scalar_lea.vmem %s1553_s9, 4096  ;;  %p1279_p1 = scmp.lt.s32.totalorder %s1553_s9, %s1277_s23 }
  0x20   : > { %1136 = vmatpush3.bf16.msra.mxu0 %v1252_v6  ;;  %1187 = vmatpush3.bf16.msra.mxu1 %v1252_v6  ;;  %p1273_p12 = scmp.ne.s32.totalorder %s1553_s9, %s1272_s19  ;;  %p1280_p2 = scmp.lt.s32.totalorder %s1278_s26, %s1272_s19 }
  0x21   : > { %1137 = vmatprep.subr.bf16.mxu0 %v1253_v7  ;;  %1180 = vmatprep.subr.bf16.mxu1 %v1253_v7 }
  0x22   : > { %p1274_p13 = pnand %p1273_p12, %p1415_p4  ;;  %p1281_p3 = por %p1280_p2, %p1279_p1 }
  0x24   : > { %1138 = vmatpush3.bf16.msra.mxu0 %v1253_v7  ;;  %1188 = vmatpush3.bf16.msra.mxu1 %v1253_v7  ;;  %p1275_p0 = pneg %p1274_p13 }
  0x25   : > { %1139 = vmatprep.subr.bf16.mxu0 %v1254_v8  ;;  %1181 = vmatprep.subr.bf16.mxu1 %v1254_v8 }
  0x26   : > { %p1282_p5 = pnand %p1281_p3, %p1275_p0 }
  0x28   : > { %1140 = vmatpush3.bf16.msra.mxu0 %v1254_v8  ;;  %1189 = vmatpush3.bf16.msra.mxu1 %v1254_v8 }
  0x29   : > { %1141 = vmatprep.subr.bf16.mxu0 %v1255_v9  ;;  %1182 = vmatprep.subr.bf16.mxu1 %v1255_v9 }
  0x2c   : > { %1142 = vmatpush3.bf16.msra.mxu0 %v1255_v9  ;;  %1190 = vmatpush3.bf16.msra.mxu1 %v1255_v9 }
  0x2f   : > { %1144 = vmatmul.mubr.bf16.vlgmr.msra.gmra.mrb[0].mxu0 %v1258_v10  ;;  %1160 = vmatmul.mubr.bf16.vlgmr.msra.gmra.mrb[0].mxu1 %v1259_v11 }
  0x30   : > { %1147 = vmatprep.mubr.bf16.mxu0 %v1260_v12  ;;  %1163 = vmatprep.mubr.bf16.mxu1 %v1261_v13 }
  0x37   : > { %1148 = vmatmul.mubr.bf16.gmra.mrb[4].mxu0 %v1262_v14  ;;  %1164 = vmatmul.mubr.bf16.gmra.mrb[4].mxu1 %v1263_v15 }
  0x38   : > { %1151 = vmatprep.mubr.bf16.mxu0 %v1264_v16  ;;  %1167 = vmatprep.mubr.bf16.mxu1 %v1265_v17 }
  0x3f   : > { %1152 = vmatmul.mubr.bf16.gmra.mrb[8].mxu0 %v1266_v18  ;;  %1168 = vmatmul.mubr.bf16.gmra.mrb[8].mxu1 %v1267_v19 }
  0x40   : > { %1155 = vmatprep.mubr.bf16.mxu0 %v1268_v20  ;;  %1171 = vmatprep.mubr.bf16.mxu1 %v1269_v21 }
  0x47   : > { %1156 = vmatmul.mubr.bf16.gmra.mrb[12].mxu0 %v1270_v22  ;;  %1172 = vmatmul.mubr.bf16.gmra.mrb[12].mxu1 %v1271_v23 }
 0x102   : > { %v1145_v25 = vpop.f32.mrb[0].mxu0  ;;  %v1161_v26 = vpop.f32.mrb[0].mxu1 }
 0x103   : > { %v781_v27 = vadd.f32 %v1145_v25, %v1480_v24  ;;  %v797_v28 = vadd.f32 %v1161_v26, %v1480_v24  ;;  %v546_v29 = vpop.f32.mrb[1].mxu0  ;;  %v610_v30 = vpop.f32.mrb[1].mxu1 }
 0x104   : > { %v779_v31 = vadd.f32 %v1480_v24, %v546_v29  ;;  %v795_v32 = vadd.f32 %v1480_v24, %v610_v30  ;;  %v1146_v33 = vpop.f32.mrb[2].mxu0  ;;  %v1162_v34 = vpop.f32.mrb[2].mxu1 }
 0x105   : > { %vm813_vm0 = vcmp.gt.f32.partialorder %v781_v27, 0.0  ;;  %v845_v35 = vmul.f32 0.1, %v781_v27  ;;  %vm829_vm1 = vcmp.gt.f32.partialorder %v797_v28, 0.0  ;;  %v861_v36 = vmul.f32 0.1, %v797_v28 }
 0x106   : > { %vm811_vm2 = vcmp.gt.f32.partialorder %v779_v31, 0.0  ;;  %v843_v37 = vmul.f32 0.1, %v779_v31  ;;  %vm827_vm3 = vcmp.gt.f32.partialorder %v795_v32, 0.0  ;;  %v859_v38 = vmul.f32 0.1, %v795_v32 }
 0x107   : > { %v877_v39 = vsel %vm813_vm0, %v781_v27, %v845_v35  ;;  %v893_v40 = vsel %vm829_vm1, %v797_v28, %v861_v36  ;;  %v782_v41 = vadd.f32 %v1146_v33, %v1480_v24  ;;  %v798_v42 = vadd.f32 %v1162_v34, %v1480_v24  ;;  %v549_v43 = vpop.f32.mrb[3].mxu0  ;;  %v613_v44 = vpop.f32.mrb[3].mxu1 }
 0x108   : > { %909 = vst [vmem:[%s1490_s7 + $0x10] sm:$0xff] %v877_v39  ;;  %925 = vst [vmem:[%s1490_s7 + $0x90] sm:$0xff] %v893_v40  ;;  %v875_v45 = vsel %vm811_vm2, %v779_v31, %v843_v37  ;;  %v891_v46 = vsel %vm827_vm3, %v795_v32, %v859_v38  ;;  %v780_v47 = vadd.f32 %v1480_v24, %v549_v43 }
 0x109   : > { %v796_v48 = vadd.f32 %v1480_v24, %v613_v44  ;;  %907 = vst [vmem:[%s1490_s7] sm:$0xff] %v875_v45  ;;  %923 = vst [vmem:[%s1490_s7 + $0x80] sm:$0xff] %v891_v46  ;;  %vm814_vm4 = vcmp.gt.f32.partialorder %v782_v41, 0.0  ;;  %v846_v49 = vmul.f32 0.1, %v782_v41  ;;  %vm830_vm5 = vcmp.gt.f32.partialorder %v798_v42, 0.0 }
 0x10a   : > { %v862_v50 = vmul.f32 0.1, %v798_v42  ;;  %vm812_vm6 = vcmp.gt.f32.partialorder %v780_v47, 0.0  ;;  %v844_v51 = vmul.f32 0.1, %v780_v47  ;;  %v1149_v55 = vpop.f32.mrb[4].mxu0 }
 0x10b   : > { %vm828_vm7 = vcmp.gt.f32.partialorder %v796_v48, 0.0  ;;  %v860_v52 = vmul.f32 0.1, %v796_v48  ;;  %v878_v53 = vsel %vm814_vm4, %v782_v41, %v846_v49  ;;  %v1165_v56 = vpop.f32.mrb[4].mxu1  ;;  %v785_v59 = vadd.f32 %v1149_v55, %v1480_v24  ;;  %v562_v61 = vpop.f32.mrb[5].mxu0 }
 0x10c   : > { %v894_v54 = vsel %vm830_vm5, %v798_v42, %v862_v50  ;;  %910 = vst [vmem:[%s1490_s7 + $0x18] sm:$0xff] %v878_v53  ;;  %v876_v57 = vsel %vm812_vm6, %v780_v47, %v844_v51  ;;  %v801_v60 = vadd.f32 %v1165_v56, %v1480_v24  ;;  %v626_v62 = vpop.f32.mrb[5].mxu1  ;;  %v783_v63 = vadd.f32 %v1480_v24, %v562_v61  ;;  %v1150_v1 = vpop.f32.mrb[6].mxu0 }
 0x10d   : > { %926 = vst [vmem:[%s1490_s7 + $0x98] sm:$0xff] %v894_v54  ;;  %v892_v58 = vsel %vm828_vm7, %v796_v48, %v860_v52  ;;  %908 = vst [vmem:[%s1490_s7 + $0x8] sm:$0xff] %v876_v57  ;;  %v799_v0 = vadd.f32 %v1480_v24, %v626_v62  ;;  %v1166_v2 = vpop.f32.mrb[6].mxu1  ;;  %vm817_vm8 = vcmp.gt.f32.partialorder %v785_v59, 0.0  ;;  %v849_v3 = vmul.f32 0.1, %v785_v59 }
 0x10e   : > { %924 = vst [vmem:[%s1490_s7 + $0x88] sm:$0xff] %v892_v58  ;;  %vm833_vm9 = vcmp.gt.f32.partialorder %v801_v60, 0.0  ;;  %v865_v4 = vmul.f32 0.1, %v801_v60  ;;  %vm815_vm10 = vcmp.gt.f32.partialorder %v783_v63, 0.0  ;;  %v786_v9 = vadd.f32 %v1150_v1, %v1480_v24  ;;  %v565_v11 = vpop.f32.mrb[7].mxu0 }
 0x10f   : > { %v847_v5 = vmul.f32 0.1, %v783_v63  ;;  %vm831_vm11 = vcmp.gt.f32.partialorder %v799_v0, 0.0  ;;  %v863_v6 = vmul.f32 0.1, %v799_v0  ;;  %v881_v7 = vsel %vm817_vm8, %v785_v59, %v849_v3  ;;  %v629_v12 = vpop.f32.mrb[7].mxu1 }
 0x110   : > { %v897_v8 = vsel %vm833_vm9, %v801_v60, %v865_v4  ;;  %v802_v10 = vadd.f32 %v1166_v2, %v1480_v24  ;;  %913 = vst [vmem:[%s1490_s7 + $0x30] sm:$0xff] %v881_v7  ;;  %v784_v15 = vadd.f32 %v1480_v24, %v565_v11  ;;  %v800_v16 = vadd.f32 %v1480_v24, %v629_v12 }
 0x111   : > { %929 = vst [vmem:[%s1490_s7 + $0xb0] sm:$0xff] %v897_v8  ;;  %v879_v13 = vsel %vm815_vm10, %v783_v63, %v847_v5  ;;  %v895_v14 = vsel %vm831_vm11, %v799_v0, %v863_v6  ;;  %vm818_vm12 = vcmp.gt.f32.partialorder %v786_v9, 0.0  ;;  %v850_v17 = vmul.f32 0.1, %v786_v9 }
 0x112   : > { %911 = vst [vmem:[%s1490_s7 + $0x20] sm:$0xff] %v879_v13  ;;  %927 = vst [vmem:[%s1490_s7 + $0xa0] sm:$0xff] %v895_v14  ;;  %vm834_vm13 = vcmp.gt.f32.partialorder %v802_v10, 0.0  ;;  %v866_v18 = vmul.f32 0.1, %v802_v10  ;;  %vm816_vm14 = vcmp.gt.f32.partialorder %v784_v15, 0.0 }
 0x113   : > { %v848_v19 = vmul.f32 0.1, %v784_v15  ;;  %vm832_vm15 = vcmp.gt.f32.partialorder %v800_v16, 0.0  ;;  %v864_v20 = vmul.f32 0.1, %v800_v16  ;;  %v882_v21 = vsel %vm818_vm12, %v786_v9, %v850_v17  ;;  %v1153_v23 = vpop.f32.mrb[8].mxu0 }
 0x114   : > { %v898_v22 = vsel %vm834_vm13, %v802_v10, %v866_v18  ;;  %v1169_v25 = vpop.f32.mrb[8].mxu1  ;;  %914 = vst [vmem:[%s1490_s7 + $0x38] sm:$0xff] %v882_v21  ;;  %v789_v28 = vadd.f32 %v1153_v23, %v1480_v24  ;;  %v578_v30 = vpop.f32.mrb[9].mxu0 }
 0x115   : > { %930 = vst [vmem:[%s1490_s7 + $0xb8] sm:$0xff] %v898_v22  ;;  %v880_v26 = vsel %vm816_vm14, %v784_v15, %v848_v19  ;;  %v896_v27 = vsel %vm832_vm15, %v800_v16, %v864_v20  ;;  %v805_v29 = vadd.f32 %v1169_v25, %v1480_v24  ;;  %v642_v31 = vpop.f32.mrb[9].mxu1  ;;  %v787_v32 = vadd.f32 %v1480_v24, %v578_v30  ;;  %v1154_v34 = vpop.f32.mrb[10].mxu0 }
 0x116   : > { %912 = vst [vmem:[%s1490_s7 + $0x28] sm:$0xff] %v880_v26  ;;  %928 = vst [vmem:[%s1490_s7 + $0xa8] sm:$0xff] %v896_v27  ;;  %v803_v33 = vadd.f32 %v1480_v24, %v642_v31  ;;  %v1170_v35 = vpop.f32.mrb[10].mxu1  ;;  %vm821_vm0 = vcmp.gt.f32.partialorder %v789_v28, 0.0  ;;  %v853_v36 = vmul.f32 0.1, %v789_v28  ;;  %v790_v42 = vadd.f32 %v1154_v34, %v1480_v24 }
 0x117   : > { %vm837_vm1 = vcmp.gt.f32.partialorder %v805_v29, 0.0  ;;  %v869_v37 = vmul.f32 0.1, %v805_v29  ;;  %vm819_vm2 = vcmp.gt.f32.partialorder %v787_v32, 0.0  ;;  %v851_v38 = vmul.f32 0.1, %v787_v32 }
 0x118   : > { %vm835_vm3 = vcmp.gt.f32.partialorder %v803_v33, 0.0  ;;  %v867_v39 = vmul.f32 0.1, %v803_v33  ;;  %v885_v40 = vsel %vm821_vm0, %v789_v28, %v853_v36  ;;  %v806_v43 = vadd.f32 %v1170_v35, %v1480_v24  ;;  %v581_v44 = vpop.f32.mrb[11].mxu0  ;;  %v645_v45 = vpop.f32.mrb[11].mxu1 }
 0x119   : > { %v901_v41 = vsel %vm837_vm1, %v805_v29, %v869_v37  ;;  %917 = vst [vmem:[%s1490_s7 + $0x50] sm:$0xff] %v885_v40  ;;  %v883_v46 = vsel %vm819_vm2, %v787_v32, %v851_v38  ;;  %v788_v48 = vadd.f32 %v1480_v24, %v581_v44  ;;  %v804_v49 = vadd.f32 %v1480_v24, %v645_v45 }
 0x11a   : > { %933 = vst [vmem:[%s1490_s7 + $0xd0] sm:$0xff] %v901_v41  ;;  %v899_v47 = vsel %vm835_vm3, %v803_v33, %v867_v39  ;;  %v1157_v50 = vpop.f32.mrb[12].mxu0  ;;  %v1173_v51 = vpop.f32.mrb[12].mxu1  ;;  %915 = vst [vmem:[%s1490_s7 + $0x40] sm:$0xff] %v883_v46  ;;  %vm822_vm4 = vcmp.gt.f32.partialorder %v790_v42, 0.0  ;;  %vm838_vm5 = vcmp.gt.f32.partialorder %v806_v43, 0.0 }
 0x11b   : > { %931 = vst [vmem:[%s1490_s7 + $0xc0] sm:$0xff] %v899_v47  ;;  %v854_v52 = vmul.f32 0.1, %v790_v42  ;;  %v870_v53 = vmul.f32 0.1, %v806_v43  ;;  %vm820_vm6 = vcmp.gt.f32.partialorder %v788_v48, 0.0  ;;  %v793_v58 = vadd.f32 %v1157_v50, %v1480_v24 }
 0x11c   : > { %v852_v54 = vmul.f32 0.1, %v788_v48  ;;  %vm836_vm7 = vcmp.gt.f32.partialorder %v804_v49, 0.0  ;;  %v868_v55 = vmul.f32 0.1, %v804_v49  ;;  %v809_v59 = vadd.f32 %v1173_v51, %v1480_v24  ;;  %v594_v60 = vpop.f32.mrb[13].mxu0 }
 0x11d   : > { %v886_v56 = vsel %vm822_vm4, %v790_v42, %v854_v52  ;;  %v902_v57 = vsel %vm838_vm5, %v806_v43, %v870_v53  ;;  %v658_v61 = vpop.f32.mrb[13].mxu1  ;;  %v791_v0 = vadd.f32 %v1480_v24, %v594_v60  ;;  %v1158_v2 = vpop.f32.mrb[14].mxu0  ;;  %vm825_vm8 = vcmp.gt.f32.partialorder %v793_v58, 0.0 }
 0x11e   : > { %918 = vst [vmem:[%s1490_s7 + $0x58] sm:$0xff] %v886_v56  ;;  %934 = vst [vmem:[%s1490_s7 + $0xd8] sm:$0xff] %v902_v57  ;;  %v884_v62 = vsel %vm820_vm6, %v788_v48, %v852_v54  ;;  %v900_v63 = vsel %vm836_vm7, %v804_v49, %v868_v55  ;;  %v807_v1 = vadd.f32 %v1480_v24, %v658_v61  ;;  %v1174_v3 = vpop.f32.mrb[14].mxu1  ;;  %v857_v4 = vmul.f32 0.1, %v793_v58  ;;  %v597_v12 = vpop.f32.mrb[15].mxu0 }
 0x11f   : > { %916 = vst [vmem:[%s1490_s7 + $0x48] sm:$0xff] %v884_v62  ;;  %932 = vst [vmem:[%s1490_s7 + $0xc8] sm:$0xff] %v900_v63  ;;  %vm841_vm9 = vcmp.gt.f32.partialorder %v809_v59, 0.0  ;;  %v873_v5 = vmul.f32 0.1, %v809_v59  ;;  %vm823_vm10 = vcmp.gt.f32.partialorder %v791_v0, 0.0  ;;  %v794_v10 = vadd.f32 %v1158_v2, %v1480_v24 }
 0x120   : > { %v855_v6 = vmul.f32 0.1, %v791_v0  ;;  %vm839_vm11 = vcmp.gt.f32.partialorder %v807_v1, 0.0  ;;  %v871_v7 = vmul.f32 0.1, %v807_v1  ;;  %v889_v8 = vsel %vm825_vm8, %v793_v58, %v857_v4  ;;  %v661_v13 = vpop.f32.mrb[15].mxu1 }
 0x121   : > { %v905_v9 = vsel %vm841_vm9, %v809_v59, %v873_v5  ;;  %v810_v11 = vadd.f32 %v1174_v3, %v1480_v24  ;;  %921 = vst [vmem:[%s1490_s7 + $0x70] sm:$0xff] %v889_v8  ;;  %v792_v16 = vadd.f32 %v1480_v24, %v597_v12  ;;  %v808_v17 = vadd.f32 %v1480_v24, %v661_v13 }
 0x122   : > { %937 = vst [vmem:[%s1490_s7 + $0xf0] sm:$0xff] %v905_v9  ;;  %v887_v14 = vsel %vm823_vm10, %v791_v0, %v855_v6  ;;  %v903_v15 = vsel %vm839_vm11, %v807_v1, %v871_v7  ;;  %vm826_vm12 = vcmp.gt.f32.partialorder %v794_v10, 0.0  ;;  %v858_v18 = vmul.f32 0.1, %v794_v10 }
 0x123   : > { %919 = vst [vmem:[%s1490_s7 + $0x60] sm:$0xff] %v887_v14  ;;  %935 = vst [vmem:[%s1490_s7 + $0xe0] sm:$0xff] %v903_v15  ;;  %vm842_vm13 = vcmp.gt.f32.partialorder %v810_v11, 0.0  ;;  %v874_v19 = vmul.f32 0.1, %v810_v11  ;;  %vm824_vm14 = vcmp.gt.f32.partialorder %v792_v16, 0.0 }
 0x124   : > { %v856_v20 = vmul.f32 0.1, %v792_v16  ;;  %vm840_vm15 = vcmp.gt.f32.partialorder %v808_v17, 0.0  ;;  %v872_v21 = vmul.f32 0.1, %v808_v17  ;;  %v890_v24 = vsel %vm826_vm12, %v794_v10, %v858_v18 }
 0x125   : > { %v906_v22 = vsel %vm842_vm13, %v810_v11, %v874_v19  ;;  %922 = vst [vmem:[%s1490_s7 + $0x78] sm:$0xff] %v890_v24 }
 0x126   : > { %938 = vst [vmem:[%s1490_s7 + $0xf8] sm:$0xff] %v906_v22  ;;  %v888_v23 = vsel %vm824_vm14, %v792_v16, %v856_v20  ;;  %v904_v25 = vsel %vm840_vm15, %v808_v17, %v872_v21 }
 0x127   : > { %920 = vst [vmem:[%s1490_s7 + $0x68] sm:$0xff] %v888_v23  ;;  %936 = vst [vmem:[%s1490_s7 + $0xe8] sm:$0xff] %v904_v25 }
 0x128   : > { %1285 = shalt.err (!%p1282_p5)
}
 0x129   : > { %s1286_s27 = scalar_lea.hbm %s1551_s11, 4096  ;;  %s1290_s30 = scalar_lea.hbm %s1610_s3, 32768 }
 0x12a   : > { %p1287_p6 = scmp.ne.s32.totalorder %s1551_s11, %s1286_s27  ;;  %p1291_p10 = scmp.lt.u32.totalorder %s1551_s11, %s1610_s3 }
 0x12b   : > { %p1292_p11 = scmp.lt.u32.totalorder %s1290_s30, %s1286_s27  ;;  %p1294_p13 = scmp.lt.u32.totalorder %s1286_s27, %s1551_s11 }
 0x12c   : > { %p1288_p7 = pnand %p1287_p6, %p1415_p4 }
 0x12d   : > { %p1293_p12 = por %p1292_p11, %p1291_p10 }
 0x12e   : > { %p1289_p9 = pneg %p1288_p7 }
 0x12f   : > { %p1295_p0 = por %p1294_p13, %p1293_p12 }
 0x131   : > { %p1296_p1 = pnand %p1295_p0, %p1289_p9 }
 0x133   : > { %1299 = shalt.err (!%p1296_p1)
}
 0x134   : > { %s1353_s6 = smov 128   ;;  %s1354_s7 = smov 8  }
 0x135   : > { %1191 = dma.vmem_to_hbm [thread:$0]  (%p1415_p4), %s1553_s9, 4096, %s1551_s11, %s1561_s18, %s1353_s6, %s1353_s6, %s1354_s7  }
 0x136 PF: > { %p1197_p2 = scmp.ge.s32.totalorder %s1350_s17, 2  ;;  %s969_s8 = sand.u32 1, %s1330_s12  }
 0x137   : > { %s970_s15 = scalar_lea.sflag [#allocation4], %s969_s8 }
 0x138   : > { %p1194_p3 = pnand %p1197_p2, %p1422_p8 }
 0x13a   : > { %1325 = dma.done.wait (!%p1194_p3), %s970_s15, 4096  }
 0x13b   : > { %1327 = vsyncadd (!%p1194_p3), %s970_s15, 4294963200  ;;  %s16_s17 = sadd.s32 1, %s1350_s17   ;;  %s1613_s12 = smov %s1334_s13 }
 0x13c   : > { %p13_p5 = scmp.ge.s32.totalorder %s16_s17, 10   ;;  %s1614_s13 = smov %s1338_s14 }
 0x13d   : > { %s1615_s14 = smov %s1428_s25  ;;  %s1616_s15 = smov %s1346_s16 }
 0x13e   : > { %s1617_s16 = smov %s1619_s20  ;;  %15 = sbr.rel (!%p13_p5) target bundleno = 4 (0x4), region = 81 }
 0x145   :  { %975 = vsyncpa [#allocation4], 1 }
 0x146   :  { %977 = vsyncpa [#allocation4 + $0x1], 1 }

</bundles_post_ra>
